<compile_context>
chip_gen: v7x
topology: tpu7x:2x2x1
jax: 0.10.0
libtpu: 0.0.40
codegen_flags: <defaults>
</compile_context>

<pallas_src>
import jax
import jax.numpy as jnp
from jax import lax
from jax.experimental import pallas as pl
from jax.experimental.pallas import tpu as pltpu


def _pick_s_tile(S: int) -> int:
    """Largest lane-dense spatial tile that divides S (falls back to full S)."""
    for cand in (2048, 1024, 512, 256, 128):
        if S % cand == 0:
            return cand
    return S


def _make_stats_kernel(n_inputs: int, s_total: int, eps: float):
    """Pass 1: accumulate per-(batch, channel) sum/sumsq of the fused 1x1-conv
    activations over the spatial axis; emit mean and rsqrt(var + eps)."""

    def kernel(*refs):
        xs = refs[:n_inputs]
        ws = refs[n_inputs:2 * n_inputs]
        b_ref = refs[2 * n_inputs]
        mean_ref = refs[2 * n_inputs + 1]
        rstd_ref = refs[2 * n_inputs + 2]
        acc_sum = refs[2 * n_inputs + 3]
        acc_sq = refs[2 * n_inputs + 4]

        s = pl.program_id(1)

        @pl.when(s == 0)
        def _():
            acc_sum[...] = jnp.zeros_like(acc_sum)
            acc_sq[...] = jnp.zeros_like(acc_sq)

        # Fused (projection_layer o fuse_features) 1x1 conv: y = W_fused @ x + b_fused.
        y = None
        for x_ref, w_ref in zip(xs, ws):
            d = jnp.dot(w_ref[...].astype(jnp.float32),
                        x_ref[0].astype(jnp.float32),
                        preferred_element_type=jnp.float32)
            y = d if y is None else y + d
        y = y + b_ref[...].astype(jnp.float32)              # (hidden, S_tile)

        acc_sum[...] += jnp.sum(y, axis=-1, keepdims=True)
        acc_sq[...] += jnp.sum(y * y, axis=-1, keepdims=True)

        @pl.when(s == pl.num_programs(1) - 1)
        def _():
            mean = acc_sum[...] * (1.0 / s_total)
            var = acc_sq[...] * (1.0 / s_total) - mean * mean   # biased variance
            rstd = lax.rsqrt(var + eps)
            mean_ref[0] = mean
            rstd_ref[0] = rstd

    return kernel


def _make_apply_kernel(n_inputs: int, negative_slope: float):
    """Pass 2: fused 1x1 conv, InstanceNorm apply, LeakyReLU, final 1x1 conv."""

    def kernel(*refs):
        xs = refs[:n_inputs]
        ws = refs[n_inputs:2 * n_inputs]
        b_ref = refs[2 * n_inputs]
        mean_ref = refs[2 * n_inputs + 1]
        rstd_ref = refs[2 * n_inputs + 2]
        wf_ref = refs[2 * n_inputs + 3]
        bf_ref = refs[2 * n_inputs + 4]
        out_ref = refs[2 * n_inputs + 5]

        y = None
        for x_ref, w_ref in zip(xs, ws):
            d = jnp.dot(w_ref[...].astype(jnp.float32),
                        x_ref[0].astype(jnp.float32),
                        preferred_element_type=jnp.float32)
            y = d if y is None else y + d
        y = y + b_ref[...].astype(jnp.float32)              # (hidden, S_tile)

        # InstanceNorm1d (no affine) + LeakyReLU; Dropout1d is identity in eval mode.
        yn = (y - mean_ref[0]) * rstd_ref[0]
        act = jnp.where(yn >= 0, yn, negative_slope * yn)

        out = jnp.dot(wf_ref[...].astype(jnp.float32), act,
                      preferred_element_type=jnp.float32)
        out = out + bf_ref[...].astype(jnp.float32)         # (num_classes, S_tile)
        out_ref[0] = out.astype(out_ref.dtype)

    return kernel


def transformer_segmentation_decoder_forward(inputs, params, *, eps=1e-5,
                                             negative_slope=0.01):
    """inputs: list of (B, C_i, H, W) feature maps already at target_image_size.
    params: w_proj (NB*hid, C), b_proj (NB*hid,), w_fuse (hid, NB*hid),
            b_fuse (hid,), w_final (K, hid), b_final (K,).
    Returns (B, num_classes, H, W)."""
    n = len(inputs)
    B, _, H, W = inputs[0].shape
    S = H * W

    # NCHW -> (B, C_i, S): pure reshape, no transpose (matches the reference's
    # cancelling permutes).
    xs = [x.reshape(x.shape[0], x.shape[1], S) for x in inputs]
    c_sizes = [int(x.shape[1]) for x in xs]

    f32 = jnp.float32
    w_proj, b_proj = params["w_proj"], params["b_proj"]
    w_fuse, b_fuse = params["w_fuse"], params["b_fuse"]
    w_final, b_final = params["w_final"], params["b_final"]

    hidden = int(w_fuse.shape[0])
    num_classes = int(w_final.shape[0])

    # Exact algebraic fusion of the two back-to-back 1x1 convs (no nonlinearity
    # in between): one (hidden x C) weight, one bias.
    w_fused = jnp.dot(w_fuse.astype(f32), w_proj.astype(f32))                 # (hidden, C)
    b_fused = (jnp.dot(w_fuse.astype(f32), b_proj.astype(f32))
               + b_fuse.astype(f32))[:, None]                                 # (hidden, 1)
    w_fin = w_final.astype(f32)                                               # (K, hidden)
    b_fin = b_final.astype(f32)[:, None]                                      # (K, 1)

    # Split the fused weight per input so the channel concat never hits HBM.
    w_splits, off = [], 0
    for c in c_sizes:
        w_splits.append(w_fused[:, off:off + c])
        off += c

    s_tile = _pick_s_tile(S)
    n_s = S // s_tile

    x_specs = [pl.BlockSpec((1, c, s_tile), lambda b, s: (b, 0, s)) for c in c_sizes]
    w_specs = [pl.BlockSpec((hidden, c), lambda b, s: (0, 0)) for c in c_sizes]
    b_spec = pl.BlockSpec((hidden, 1), lambda b, s: (0, 0))
    stat_spec = pl.BlockSpec((1, hidden, 1), lambda b, s: (b, 0, 0))
    wf_spec = pl.BlockSpec((num_classes, hidden), lambda b, s: (0, 0))
    bf_spec = pl.BlockSpec((num_classes, 1), lambda b, s: (0, 0))
    out_spec = pl.BlockSpec((1, num_classes, s_tile), lambda b, s: (b, 0, s))

    # ---- pass 1: InstanceNorm statistics (sum / sumsq over spatial axis) ----
    mean, rstd = pl.pallas_call(
        _make_stats_kernel(n, S, eps),
        out_shape=(jax.ShapeDtypeStruct((B, hidden, 1), f32),
                   jax.ShapeDtypeStruct((B, hidden, 1), f32)),
        grid_spec=pltpu.PrefetchScalarGridSpec(
            num_scalar_prefetch=0,
            grid=(B, n_s),
            in_specs=x_specs + w_specs + [b_spec],
            out_specs=[stat_spec, stat_spec],
            scratch_shapes=[pltpu.VMEM((hidden, 1), f32),
                            pltpu.VMEM((hidden, 1), f32)]),
        compiler_params=pltpu.CompilerParams(
            dimension_semantics=("parallel", "arbitrary")),
    )(*xs, *w_splits, b_fused)

    # ---- pass 2: normalize + LeakyReLU + final conv, lane-dense output ------
    out_flat = pl.pallas_call(
        _make_apply_kernel(n, negative_slope),
        out_shape=jax.ShapeDtypeStruct((B, num_classes, S), inputs[0].dtype),
        grid_spec=pltpu.PrefetchScalarGridSpec(
            num_scalar_prefetch=0,
            grid=(B, n_s),
            in_specs=x_specs + w_specs + [b_spec, stat_spec, stat_spec,
                                          wf_spec, bf_spec],
            out_specs=out_spec),
        compiler_params=pltpu.CompilerParams(
            dimension_semantics=("parallel", "parallel")),
    )(*xs, *w_splits, b_fused, mean, rstd, w_fin, b_fin)

    # upsample_tensor: S = H*W is already a perfect square, so the interpolation
    # is the identity and only the view to (B, K, H, W) remains.
    return out_flat.reshape(B, num_classes, H, W)


def _reference_forward(inputs, params, *, eps=1e-5, negative_slope=0.01):
    """Pure-JAX reference mirroring the PyTorch forward (eval mode)."""
    x = jnp.concatenate(inputs, axis=1)                   # (B, C, H, W)
    B, C, H, W = x.shape
    x = x.reshape(B, C, H * W).astype(jnp.float32)
    proj = jnp.einsum("oc,bcs->bos", params["w_proj"].astype(jnp.float32), x)
    proj = proj + params["b_proj"].astype(jnp.float32)[None, :, None]
    fused = jnp.einsum("ho,bos->bhs", params["w_fuse"].astype(jnp.float32), proj)
    fused = fused + params["b_fuse"].astype(jnp.float32)[None, :, None]
    mean = jnp.mean(fused, axis=-1, keepdims=True)
    var = jnp.mean((fused - mean) ** 2, axis=-1, keepdims=True)   # biased
    norm = (fused - mean) / jnp.sqrt(var + eps)
    act = jnp.where(norm >= 0, norm, negative_slope * norm)
    out = jnp.einsum("kh,bhs->bks", params["w_final"].astype(jnp.float32), act)
    out = out + params["b_final"].astype(jnp.float32)[None, :, None]
    return out.reshape(B, -1, H, W)


if __name__ == "__main__":
    B, H, W = 2, 16, 16
    c_sizes = (4, 4)          # two feature maps, 4 channels each (num_blocks = 2)
    hidden = 32
    num_blocks = len(c_sizes)
    num_classes = 5
    C = sum(c_sizes)

    key = jax.random.PRNGKey(0)
    keys = jax.random.split(key, 8)
    inputs = [jax.random.normal(keys[i], (B, c, H, W), dtype=jnp.float32)
              for i, c in enumerate(c_sizes)]
    params = {
        "w_proj": 0.1 * jax.random.normal(keys[2], (num_blocks * hidden, C), jnp.float32),
        "b_proj": 0.1 * jax.random.normal(keys[3], (num_blocks * hidden,), jnp.float32),
        "w_fuse": 0.1 * jax.random.normal(keys[4], (hidden, num_blocks * hidden), jnp.float32),
        "b_fuse": 0.1 * jax.random.normal(keys[5], (hidden,), jnp.float32),
        "w_final": 0.1 * jax.random.normal(keys[6], (num_classes, hidden), jnp.float32),
        "b_final": 0.1 * jax.random.normal(keys[7], (num_classes,), jnp.float32),
    }

    out = transformer_segmentation_decoder_forward(inputs, params)
    out = jax.block_until_ready(out)

    ref = _reference_forward(inputs, params)
    assert out.shape == (B, num_classes, H, W), out.shape
    assert bool(jnp.all(jnp.isfinite(out))), "non-finite output"
    err = float(jnp.max(jnp.abs(out - ref)))
    assert err < 1e-2, f"mismatch vs reference: max abs err = {err}"
    print("KERNEL_OK")
</pallas_src>

<mosaic_0001>
module attributes {stable_mosaic.version = 11 : i64} {
  func.func @kernel(%arg0: i32, %arg1: i32, %arg2: memref<1x4x256xf32, #tpu.memory_space<vmem>>, %arg3: memref<1x4x256xf32, #tpu.memory_space<vmem>>, %arg4: memref<32x4xf32, #tpu.memory_space<vmem>>, %arg5: memref<32x4xf32, #tpu.memory_space<vmem>>, %arg6: memref<32x1xf32, #tpu.memory_space<vmem>>, %arg7: memref<1x32x1xf32, #tpu.memory_space<vmem>>, %arg8: memref<1x32x1xf32, #tpu.memory_space<vmem>>, %arg9: memref<32x1xf32, #tpu.memory_space<vmem>>, %arg10: memref<32x1xf32, #tpu.memory_space<vmem>>) attributes {dimension_semantics = [#tpu.dimension_semantics<parallel>, #tpu.dimension_semantics<arbitrary>], iteration_bounds = array<i64: 2, 1>, scalar_prefetch = 0 : i64, scratch_operands = 2 : i64, tpu.core_type = #tpu.core_type<tc>, window_params = [{transform_indices = @transform_0, window_bounds = array<i64: 1, 4, 256>}, {transform_indices = @transform_1, window_bounds = array<i64: 1, 4, 256>}, {pipeline_mode = #tpu.pipeline_mode<synchronous>, transform_indices = @transform_2, window_bounds = array<i64: 32, 4>}, {pipeline_mode = #tpu.pipeline_mode<synchronous>, transform_indices = @transform_3, window_bounds = array<i64: 32, 4>}, {pipeline_mode = #tpu.pipeline_mode<synchronous>, transform_indices = @transform_4, window_bounds = array<i64: 32, 1>}, {transform_indices = @transform_5, window_bounds = array<i64: 1, 32, 1>}, {transform_indices = @transform_6, window_bounds = array<i64: 1, 32, 1>}]} {
    %c0_i32 = arith.constant 0 : i32
    %0 = arith.cmpi eq, %arg1, %c0_i32 : i32
    %1 = arith.extui %0 : i1 to i32
    %c0_i32_0 = arith.constant 0 : i32
    %2 = arith.cmpi ne, %1, %c0_i32_0 : i32
    scf.if %2 {
      %cst_25 = arith.constant 0.000000e+00 : f32
      %29 = vector.broadcast %cst_25 : f32 to vector<32x1xf32>
      %c0_26 = arith.constant 0 : index
      %c0_27 = arith.constant 0 : index
      %30 = vector.load %arg9[%c0_26, %c0_27] : memref<32x1xf32, #tpu.memory_space<vmem>>, vector<32x1xf32>
      tpu.vector_store %arg9[%c0_26, %c0_27], %29 {strides = array<i32>} : memref<32x1xf32, #tpu.memory_space<vmem>>, vector<32x1xf32>,
      %cst_28 = arith.constant 0.000000e+00 : f32
      %31 = vector.broadcast %cst_28 : f32 to vector<32x1xf32>
      %c0_29 = arith.constant 0 : index
      %c0_30 = arith.constant 0 : index
      %32 = vector.load %arg10[%c0_29, %c0_30] : memref<32x1xf32, #tpu.memory_space<vmem>>, vector<32x1xf32>
      tpu.vector_store %arg10[%c0_29, %c0_30], %31 {strides = array<i32>} : memref<32x1xf32, #tpu.memory_space<vmem>>, vector<32x1xf32>,
    } else {
    }
    %c0 = arith.constant 0 : index
    %c0_1 = arith.constant 0 : index
    %3 = vector.load %arg4[%c0, %c0_1] : memref<32x4xf32, #tpu.memory_space<vmem>>, vector<32x4xf32>
    %c0_2 = arith.constant 0 : index
    %c0_3 = arith.constant 0 : index
    %c0_4 = arith.constant 0 : index
    %4 = vector.load %arg2[%c0_2, %c0_3, %c0_4] : memref<1x4x256xf32, #tpu.memory_space<vmem>>, vector<1x4x256xf32>
    %5 = vector.shape_cast %4 : vector<1x4x256xf32> to vector<4x256xf32>
    %cst = arith.constant dense<0.000000e+00> : vector<32x256xf32>
    %6 = tpu.matmul %3, %5, %cst {dimension_numbers = #tpu.dot_dimension_numbers<[1], [0], [0], [1], [0, 0, 1, 1], [], []>} : vector<32x4xf32>, vector<4x256xf32>, vector<32x256xf32> -> vector<32x256xf32>
    %c0_5 = arith.constant 0 : index
    %c0_6 = arith.constant 0 : index
    %7 = vector.load %arg5[%c0_5, %c0_6] : memref<32x4xf32, #tpu.memory_space<vmem>>, vector<32x4xf32>
    %c0_7 = arith.constant 0 : index
    %c0_8 = arith.constant 0 : index
    %c0_9 = arith.constant 0 : index
    %8 = vector.load %arg3[%c0_7, %c0_8, %c0_9] : memref<1x4x256xf32, #tpu.memory_space<vmem>>, vector<1x4x256xf32>
    %9 = vector.shape_cast %8 : vector<1x4x256xf32> to vector<4x256xf32>
    %cst_10 = arith.constant dense<0.000000e+00> : vector<32x256xf32>
    %10 = tpu.matmul %7, %9, %cst_10 {dimension_numbers = #tpu.dot_dimension_numbers<[1], [0], [0], [1], [0, 0, 1, 1], [], []>} : vector<32x4xf32>, vector<4x256xf32>, vector<32x256xf32> -> vector<32x256xf32>
    %11 = arith.addf %6, %10 : vector<32x256xf32>
    %c0_11 = arith.constant 0 : index
    %c0_12 = arith.constant 0 : index
    %12 = vector.load %arg6[%c0_11, %c0_12] : memref<32x1xf32, #tpu.memory_space<vmem>>, vector<32x1xf32>
    %13 = vector.broadcast %12 : vector<32x1xf32> to vector<32x256xf32>
    %14 = arith.addf %11, %13 : vector<32x256xf32>
    %c0_13 = arith.constant 0 : index
    %c0_14 = arith.constant 0 : index
    %15 = vector.load %arg9[%c0_13, %c0_14] : memref<32x1xf32, #tpu.memory_space<vmem>>, vector<32x1xf32>
    %cst_15 = arith.constant dense<0.000000e+00> : vector<32xf32>
    %16 = vector.multi_reduction <add>, %14, %cst_15 [1] : vector<32x256xf32> to vector<32xf32>
    %17 = vector.shape_cast %16 : vector<32xf32> to vector<32x1xf32>
    %18 = arith.addf %15, %17 : vector<32x1xf32>
    %c0_16 = arith.constant 0 : index
    %c0_17 = arith.constant 0 : index
    %19 = vector.load %arg9[%c0_16, %c0_17] : memref<32x1xf32, #tpu.memory_space<vmem>>, vector<32x1xf32>
    tpu.vector_store %arg9[%c0_16, %c0_17], %18 {strides = array<i32>} : memref<32x1xf32, #tpu.memory_space<vmem>>, vector<32x1xf32>,
    %c0_18 = arith.constant 0 : index
    %c0_19 = arith.constant 0 : index
    %20 = vector.load %arg10[%c0_18, %c0_19] : memref<32x1xf32, #tpu.memory_space<vmem>>, vector<32x1xf32>
    %21 = arith.mulf %14, %14 : vector<32x256xf32>
    %cst_20 = arith.constant dense<0.000000e+00> : vector<32xf32>
    %22 = vector.multi_reduction <add>, %21, %cst_20 [1] : vector<32x256xf32> to vector<32xf32>
    %23 = vector.shape_cast %22 : vector<32xf32> to vector<32x1xf32>
    %24 = arith.addf %20, %23 : vector<32x1xf32>
    %c0_21 = arith.constant 0 : index
    %c0_22 = arith.constant 0 : index
    %25 = vector.load %arg10[%c0_21, %c0_22] : memref<32x1xf32, #tpu.memory_space<vmem>>, vector<32x1xf32>
    tpu.vector_store %arg10[%c0_21, %c0_22], %24 {strides = array<i32>} : memref<32x1xf32, #tpu.memory_space<vmem>>, vector<32x1xf32>,
    %c0_i32_23 = arith.constant 0 : i32
    %26 = arith.cmpi eq, %arg1, %c0_i32_23 : i32
    %27 = arith.extui %26 : i1 to i32
    %c0_i32_24 = arith.constant 0 : i32
    %28 = arith.cmpi ne, %27, %c0_i32_24 : i32
    scf.if %28 {
      %c0_25 = arith.constant 0 : index
      %c0_26 = arith.constant 0 : index
      %29 = vector.load %arg9[%c0_25, %c0_26] : memref<32x1xf32, #tpu.memory_space<vmem>>, vector<32x1xf32>
      %cst_27 = arith.constant 3.906250e-03 : f32
      %30 = vector.broadcast %cst_27 : f32 to vector<32x1xf32>
      %31 = arith.mulf %29, %30 : vector<32x1xf32>
      %c0_28 = arith.constant 0 : index
      %c0_29 = arith.constant 0 : index
      %32 = vector.load %arg10[%c0_28, %c0_29] : memref<32x1xf32, #tpu.memory_space<vmem>>, vector<32x1xf32>
      %cst_30 = arith.constant 3.906250e-03 : f32
      %33 = vector.broadcast %cst_30 : f32 to vector<32x1xf32>
      %34 = arith.mulf %32, %33 : vector<32x1xf32>
      %35 = arith.mulf %31, %31 : vector<32x1xf32>
      %36 = arith.subf %34, %35 : vector<32x1xf32>
      %cst_31 = arith.constant 9.99999974E-6 : f32
      %37 = vector.broadcast %cst_31 : f32 to vector<32x1xf32>
      %38 = arith.addf %36, %37 : vector<32x1xf32>
      %39 = math.rsqrt %38 : vector<32x1xf32>
      %c0_32 = arith.constant 0 : index
      %c0_33 = arith.constant 0 : index
      %c0_34 = arith.constant 0 : index
      %40 = vector.load %arg7[%c0_32, %c0_33, %c0_34] : memref<1x32x1xf32, #tpu.memory_space<vmem>>, vector<1x32x1xf32>
      %41 = vector.shape_cast %40 : vector<1x32x1xf32> to vector<32x1xf32>
      %42 = vector.shape_cast %31 : vector<32x1xf32> to vector<1x32x1xf32>
      tpu.vector_store %arg7[%c0_32, %c0_33, %c0_34], %42 {strides = array<i32>} : memref<1x32x1xf32, #tpu.memory_space<vmem>>, vector<1x32x1xf32>,
      %c0_35 = arith.constant 0 : index
      %c0_36 = arith.constant 0 : index
      %c0_37 = arith.constant 0 : index
      %43 = vector.load %arg8[%c0_35, %c0_36, %c0_37] : memref<1x32x1xf32, #tpu.memory_space<vmem>>, vector<1x32x1xf32>
      %44 = vector.shape_cast %43 : vector<1x32x1xf32> to vector<32x1xf32>
      %45 = vector.shape_cast %39 : vector<32x1xf32> to vector<1x32x1xf32>
      tpu.vector_store %arg8[%c0_35, %c0_36, %c0_37], %45 {strides = array<i32>} : memref<1x32x1xf32, #tpu.memory_space<vmem>>, vector<1x32x1xf32>,
    } else {
    }
    return
  }
  func.func @transform_0(%arg0: i32, %arg1: i32) -> (i32, i32, i32) {
    %c0_i32 = arith.constant 0 : i32
    %c0_i32_0 = arith.constant 0 : i32
    return %arg0, %c0_i32, %arg1 : i32, i32, i32
  }
  func.func @transform_1(%arg0: i32, %arg1: i32) -> (i32, i32, i32) {
    %c0_i32 = arith.constant 0 : i32
    %c0_i32_0 = arith.constant 0 : i32
    return %arg0, %c0_i32, %arg1 : i32, i32, i32
  }
  func.func @transform_2(%arg0: i32, %arg1: i32) -> (i32, i32) {
    %c0_i32 = arith.constant 0 : i32
    %c0_i32_0 = arith.constant 0 : i32
    %c0_i32_1 = arith.constant 0 : i32
    return %c0_i32, %c0_i32_0 : i32, i32
  }
  func.func @transform_3(%arg0: i32, %arg1: i32) -> (i32, i32) {
    %c0_i32 = arith.constant 0 : i32
    %c0_i32_0 = arith.constant 0 : i32
    %c0_i32_1 = arith.constant 0 : i32
    return %c0_i32, %c0_i32_0 : i32, i32
  }
  func.func @transform_4(%arg0: i32, %arg1: i32) -> (i32, i32) {
    %c0_i32 = arith.constant 0 : i32
    %c0_i32_0 = arith.constant 0 : i32
    %c0_i32_1 = arith.constant 0 : i32
    return %c0_i32, %c0_i32_0 : i32, i32
  }
  func.func @transform_5(%arg0: i32, %arg1: i32) -> (i32, i32, i32) {
    %c0_i32 = arith.constant 0 : i32
    %c0_i32_0 = arith.constant 0 : i32
    %c0_i32_1 = arith.constant 0 : i32
    return %arg0, %c0_i32, %c0_i32_0 : i32, i32, i32
  }
  func.func @transform_6(%arg0: i32, %arg1: i32) -> (i32, i32, i32) {
    %c0_i32 = arith.constant 0 : i32
    %c0_i32_0 = arith.constant 0 : i32
    %c0_i32_1 = arith.constant 0 : i32
    return %arg0, %c0_i32, %c0_i32_0 : i32, i32, i32
  }
}

</mosaic_0001>

<bundles_post_ra>
// kernel: tpu_custom_call.1
= control target key start
LH: loop header
LB: loop body
LE: loop exit
PB: predicated region body
PF: predicated region fallthrough
CT: control target
= control target key end

     0   :  { %s958_s21 = smov 0   ;;  %s960_s22 = smov 0   ;;  %s1079_s0 = inlined_call_operand.vmem [shape: f32[2,4,256], index: 0, kind: input, shape index: {}]   ;;  %s1080_s1 = inlined_call_operand.vmem [shape: f32[2,4,256], index: 1, kind: input, shape index: {}]   ;;  %s1081_s2 = inlined_call_operand.vmem [shape: f32[32,4], index: 2, kind: input, shape index: {}]   ;;  %s1082_s3 = inlined_call_operand.vmem [shape: f32[32,4], index: 3, kind: input, shape index: {}]   ;;  %s1083_s4 = inlined_call_operand.vmem [shape: f32[32,1], index: 4, kind: input, shape index: {}]   ;;  %s1084_s5 = inlined_call_operand.vmem [shape: f32[2,32,1], index: 5, kind: output, shape index: {0}]   ;;  %s1085_s6 = inlined_call_operand.vmem [shape: f32[2,32,1], index: 6, kind: output, shape index: {1}]  }
   0x1   :  { %s962_s23 = smov 0  }
   0x2 LB: > { %s29_s24 = sadd.s32 1, %s915_s22  ;;  %p824_p0 = scmp.ge.s32.totalorder %s919_s23, 1  ;;  %s919_s23 = sphi %s962_s23, %s17_s23   ;;  %s915_s22 = sphi %s960_s22, %s1087_s22   ;;  %s911_s21 = sphi %s958_s21, %s1086_s21  }
   0x3   : > { %p31_p1 = scmp.ge.s32.totalorder %s29_s24, 2  ;;  %p251_p2 = scmp.lt.s32.totalorder %s919_s23, 3 }
   0x5   : > { %s1089_s24 = smov (%p31_p1, %s29_s24), 0  ;;  %p252_p3 = pnand %p824_p0, %p251_p2 }
   0x6   : > { %p300_p4 = scmp.lt.s32.totalorder (!%p252_p3), %s911_s21, 1  ;;  %v921_v0 = vmov (!%p252_p3), 0.0   ;;  %v922_v1 = vmov (!%p252_p3), 0   ;;  %v568_v2 = vld [vmem:[%s1083_s4] sm:$0xff] (!%p252_p3)  ;;  %v570_v3 = vld [vmem:[%s1083_s4 + $0x10] sm:$0xff] (!%p252_p3)  ;;  %v569_v4 = vld [vmem:[%s1083_s4 + $0x8] sm:$0xff] (!%p252_p3) }
   0x7   : > { %255 = sbr.rel (%p252_p3) target bundleno = 430 (0x1ae), region = 40  ;;  %436 = vmatprep.mubr.f32.mxu1 (!%p252_p3), %v921_v0  ;;  %543 = vmatprep.mubr.f32.mxu0 (!%p252_p3), %v921_v0  ;;  %v571_v5 = vld [vmem:[%s1083_s4 + $0x18] sm:$0xff] (!%p252_p3)  ;;  %vm367_vm0 = vcmask (!%p252_p3), 1043456   ;;  %v347_v10 = vld [vmem:[%s1082_s3] sm:$0xff] (!%p252_p3)  ;;  %vm354_vm1 = vcmask (!%p252_p3), 31744   ;;  %v348_v12 = vld [vmem:[%s1082_s3 + $0x8] sm:$0xff] (!%p252_p3) }
   0x8   : > { %885 = vset.pattern.permute.xlu0 (!%p252_p3), %v922_v1  ;;  %886 = vset.pattern.permute.xlu1 (!%p252_p3), %v922_v1  ;;  %v342_v11 = vld [vmem:[%s1081_s2] sm:$0xff] (!%p252_p3)  ;;  %v343_v13 = vld [vmem:[%s1081_s2 + $0x8] sm:$0xff] (!%p252_p3)  ;;  %v349_v14 = vld [vmem:[%s1082_s3 + $0x10] sm:$0xff] (!%p252_p3)  ;;  %vm333_vm2 = vcmask (!%p252_p3), 7168  }
   0x9   : > { %574 = vperm.xlu0 (!%p252_p3), %885, %v568_v2   ;;  %584 = vperm.xlu1 (!%p252_p3), %886, %v570_v3   ;;  %v344_v15 = vld [vmem:[%s1081_s2 + $0x10] sm:$0xff] (!%p252_p3)  ;;  %v350_v16 = vld [vmem:[%s1082_s3 + $0x18] sm:$0xff] (!%p252_p3)  ;;  %334 = vst.msk [vmem:[#allocation2] sm:$0xff] (!%p252_p3), %vm333_vm2, %v921_v0  ;;  %335 = vst.msk [vmem:[#allocation2 + $0x8] sm:$0xff] (!%p252_p3), %vm333_vm2, %v921_v0 }
   0xa   : > { %v345_v17 = vld [vmem:[%s1081_s2 + $0x18] sm:$0xff] (!%p252_p3)  ;;  %336 = vst.msk [vmem:[#allocation2 + $0x10] sm:$0xff] (!%p252_p3), %vm333_vm2, %v921_v0  ;;  %337 = vst.msk [vmem:[#allocation2 + $0x18] sm:$0xff] (!%p252_p3), %vm333_vm2, %v921_v0 }
   0xb   : > { %338 = vst.msk [vmem:[#allocation3] sm:$0xff] (!%p252_p3), %vm333_vm2, %v921_v0  ;;  %339 = vst.msk [vmem:[#allocation3 + $0x8] sm:$0xff] (!%p252_p3), %vm333_vm2, %v921_v0 }
   0xc   : > { %340 = vst.msk [vmem:[#allocation3 + $0x10] sm:$0xff] (!%p252_p3), %vm333_vm2, %v921_v0  ;;  %341 = vst.msk [vmem:[#allocation3 + $0x18] sm:$0xff] (!%p252_p3), %vm333_vm2, %v921_v0 }
   0xd   : > { %579 = vperm.xlu0 (!%p252_p3), %885, %v569_v4   ;;  %589 = vperm.xlu1 (!%p252_p3), %886, %v571_v5  }
   0xe   : > { %s1091_s21 = smov (!%p300_p4, %s911_s21), 1 }
   0xf   : > { %s847_s29 = sshll.u32 %s1091_s21, 3  ;;  %s849_s12 = sshll.u32 %s1091_s21, 5 }
  0x10   : > { %s317_s8 = scalar_lea.vmem %s1080_s1, %s847_s29  ;;  %s307_s15 = scalar_lea.vmem %s1079_s0, %s847_s29 }
  0x11   : > { %v351_v6 = vld [vmem:[%s317_s8] sm:$0xff]  ;;  %s328_s18 = scalar_lea.vmem %s1085_s6, %s849_s12 }
  0x12   : > { %v353_v7 = vcombine.high %v351_v6, %v351_v6  ;;  %v346_v8 = vld [vmem:[%s307_s15] sm:$0xff]  ;;  %s1047_s15 = scalar_lea.vmem %s1084_s5, %s849_s12 }
  0x13   : > { %v462_v9 = vcombine.high %v346_v8, %v346_v8 }
  0x14   : > { %833 = vmatprep.subr.msk.mxu1 %vm367_vm0, %v353_v7 }
  0x15   : > { %839 = vmatprep.subr.msk.mxu0 %vm367_vm0, %v462_v9  ;;  %834 = vmatpush1.msk.msra.mxu1 %vm367_vm0, %v351_v6  ;;  %v600_v6 = vld [vmem:[#allocation2] sm:$0xff] }
  0x16   : > { %840 = vmatpush1.msk.msra.mxu0 %vm367_vm0, %v346_v8  ;;  %835 = vmatmul.mubr.msk.f32.vlgmr.msra.gmra.mrb[0].mxu1 %vm354_vm1, %v347_v10  ;;  %v625_v8 = vld [vmem:[#allocation3] sm:$0xff] }
  0x17   : > { %841 = vmatmul.mubr.msk.f32.vlgmr.msra.gmra.mrb[0].mxu0 %vm354_vm1, %v342_v11  ;;  %442 = vmatprep.mubr.f32.mxu1 %v921_v0 }
  0x18   : > { %549 = vmatprep.mubr.f32.mxu0 %v921_v0 }
  0x1a   : > { %836 = vmatmul.mubr.msk.f32.gmra.mrb[2].mxu1 %vm354_vm1, %v348_v12  ;;  %v601_v12 = vld [vmem:[#allocation2 + $0x8] sm:$0xff] }
  0x1b   : > { %842 = vmatmul.mubr.msk.f32.gmra.mrb[2].mxu0 %vm354_vm1, %v343_v13  ;;  %448 = vmatprep.mubr.f32.mxu1 %v921_v0  ;;  %v626_v13 = vld [vmem:[#allocation3 + $0x8] sm:$0xff] }
  0x1c   : > { %555 = vmatprep.mubr.f32.mxu0 %v921_v0 }
  0x1e   : > { %837 = vmatmul.mubr.msk.f32.gmra.mrb[4].mxu1 %vm354_vm1, %v349_v14 }
  0x1f   : > { %843 = vmatmul.mubr.msk.f32.gmra.mrb[4].mxu0 %vm354_vm1, %v344_v15  ;;  %454 = vmatprep.mubr.f32.mxu1 %v921_v0 }
  0x20   : > { %561 = vmatprep.mubr.f32.mxu0 %v921_v0 }
  0x22   : > { %838 = vmatmul.mubr.msk.f32.gmra.mrb[6].mxu1 %vm354_vm1, %v350_v16 }
  0x23   : > { %844 = vmatmul.mubr.msk.f32.gmra.mrb[6].mxu0 %vm354_vm1, %v345_v17 }
  0x88   : > { %v575_v18 = vpop.permute.xlu0 %574  ;;  %v585_v32 = vpop.permute.xlu1 %584 }
  0x8c   : > { %v580_v34 = vpop.permute.xlu0 %579  ;;  %v590_v52 = vpop.permute.xlu1 %589 }
  0xe9   : > { %v438_v19 = vpop.f32.mrb[0].mxu1 }
  0xea   : > { %v545_v20 = vpop.f32.mrb[0].mxu0  ;;  %v440_v21 = vpop.f32.mrb[1].mxu1 }
  0xeb   : > { %v546_v22 = vadd.f32 %v545_v20, %v438_v19  ;;  %v547_v23 = vpop.f32.mrb[1].mxu0  ;;  %v627_v19 = vld [vmem:[#allocation3 + $0x10] sm:$0xff] }
  0xec   : > { %v548_v24 = vadd.f32 %v547_v23, %v440_v21 }
  0xed   : > { %v592_v25 = vadd.f32 %v575_v18, %v546_v22  ;;  %v444_v26 = vpop.f32.mrb[2].mxu1 }
  0xee   : > { %v593_v27 = vadd.f32 %v575_v18, %v548_v24  ;;  %v551_v28 = vpop.f32.mrb[2].mxu0  ;;  %v446_v29 = vpop.f32.mrb[3].mxu1  ;;  %v602_v18 = vld [vmem:[#allocation2 + $0x10] sm:$0xff] }
  0xef   : > { %v552_v30 = vadd.f32 %v551_v28, %v444_v26  ;;  %v553_v31 = vpop.f32.mrb[3].mxu0  ;;  %v629_v33 = vmul.f32 %v592_v25, %v592_v25 }
  0xf0   : > { %v554_v35 = vadd.f32 %v553_v31, %v446_v29  ;;  %v604_v36 = vadd.f32 %v593_v27, %v592_v25  ;;  %v630_v37 = vmul.f32 %v593_v27, %v593_v27  ;;  %v603_v27 = vld [vmem:[#allocation2 + $0x18] sm:$0xff] }
  0xf1   : > { %v594_v38 = vadd.f32 %v580_v34, %v552_v30  ;;  %v450_v39 = vpop.f32.mrb[4].mxu1 }
  0xf2   : > { %v595_v40 = vadd.f32 %v580_v34, %v554_v35  ;;  %605 = vadd.xlane.f32.xlu0 %v604_v36  ;;  %v557_v41 = vpop.f32.mrb[4].mxu0  ;;  %v452_v42 = vpop.f32.mrb[5].mxu1  ;;  %v637_v43 = vadd.f32 %v630_v37, %v629_v33  ;;  %v628_v35 = vld [vmem:[#allocation3 + $0x18] sm:$0xff] }
  0xf3   : > { %v558_v44 = vadd.f32 %v557_v41, %v450_v39  ;;  %v559_v45 = vpop.f32.mrb[5].mxu0  ;;  %v631_v46 = vmul.f32 %v594_v38, %v594_v38 }
  0xf4   : > { %v560_v47 = vadd.f32 %v559_v45, %v452_v42  ;;  %638 = vadd.xlane.f32.xlu1 %v637_v43  ;;  %v607_v48 = vadd.f32 %v595_v40, %v594_v38  ;;  %v632_v49 = vmul.f32 %v595_v40, %v595_v40 }
  0xf5   : > { %v596_v50 = vadd.f32 %v585_v32, %v558_v44  ;;  %v456_v51 = vpop.f32.mrb[6].mxu1 }
  0xf6   : > { %v597_v53 = vadd.f32 %v585_v32, %v560_v47  ;;  %v563_v54 = vpop.f32.mrb[6].mxu0  ;;  %v458_v55 = vpop.f32.mrb[7].mxu1  ;;  %v640_v56 = vadd.f32 %v632_v49, %v631_v46 }
  0xf7   : > { %v564_v57 = vadd.f32 %v563_v54, %v456_v51  ;;  %v565_v58 = vpop.f32.mrb[7].mxu0  ;;  %v633_v59 = vmul.f32 %v596_v50, %v596_v50 }
  0xf8   : > { %v566_v60 = vadd.f32 %v565_v58, %v458_v55  ;;  %608 = vadd.xlane.f32.xlu1 %v607_v48  ;;  %641 = vadd.xlane.f32.xlu0 %v640_v56  ;;  %v610_v61 = vadd.f32 %v597_v53, %v596_v50  ;;  %v634_v62 = vmul.f32 %v597_v53, %v597_v53 }
  0xf9   : > { %v598_v63 = vadd.f32 %v590_v52, %v564_v57 }
  0xfa   : > { %v599_v0 = vadd.f32 %v590_v52, %v566_v60  ;;  %v643_v1 = vadd.f32 %v634_v62, %v633_v59 }
  0xfb   : > { %v635_v2 = vmul.f32 %v598_v63, %v598_v63 }
  0xfc   : > { %611 = vadd.xlane.f32.xlu0 %v610_v61  ;;  %644 = vadd.xlane.f32.xlu1 %v643_v1  ;;  %v613_v3 = vadd.f32 %v599_v0, %v598_v63  ;;  %v636_v4 = vmul.f32 %v599_v0, %v599_v0 }
  0xfe   : > { %v646_v5 = vadd.f32 %v636_v4, %v635_v2 }
 0x100   : > { %614 = vadd.xlane.f32.xlu0 %v613_v3 }
 0x104   : > { %647 = vadd.xlane.f32.xlu0 %v646_v5 }
 0x17f   : > { %v606_v7 = vpop.xlane.xlu0 %605 }
 0x180   : > { %v616_v9 = vadd.f32 %v606_v7, %v600_v6 }
 0x181   : > { %v639_v10 = vpop.xlane.xlu1 %638 }
 0x182   : > { %621 = vst.msk [vmem:[#allocation2] sm:$0xff] %vm333_vm2, %v616_v9  ;;  %v649_v11 = vadd.f32 %v639_v10, %v625_v8 }
 0x184   : > { %653 = vst.msk [vmem:[#allocation3] sm:$0xff] %vm333_vm2, %v649_v11 }
 0x185   : > { %v609_v14 = vpop.xlane.xlu1 %608  ;;  %v642_v15 = vpop.xlane.xlu0 %641 }
 0x186   : > { %v617_v16 = vadd.f32 %v609_v14, %v601_v12  ;;  %v650_v17 = vadd.f32 %v642_v15, %v626_v13 }
 0x188   : > { %622 = vst.msk [vmem:[#allocation2 + $0x8] sm:$0xff] %vm333_vm2, %v617_v16  ;;  %654 = vst.msk [vmem:[#allocation3 + $0x8] sm:$0xff] %vm333_vm2, %v650_v17 }
 0x189   : > { %v660_v20 = vld [vmem:[#allocation2] sm:$0xff]  ;;  %v612_v21 = vpop.xlane.xlu0 %611  ;;  %v645_v22 = vpop.xlane.xlu1 %644 }
 0x18a   : > { %v664_v23 = vmul.f32 0.00390625, %v660_v20  ;;  %v618_v24 = vadd.f32 %v612_v21, %v602_v18  ;;  %v651_v25 = vadd.f32 %v645_v22, %v627_v19 }
 0x18b   : > { %v668_v26 = vld [vmem:[#allocation3] sm:$0xff] }
 0x18c   : > { %v676_v28 = vmul.f32 %v664_v23, %v664_v23  ;;  %692 = vst.msk [vmem:[%s1047_s15] sm:$0xff] %vm333_vm2, %v664_v23  ;;  %v672_v29 = vmul.f32 0.00390625, %v668_v26  ;;  %623 = vst.msk [vmem:[#allocation2 + $0x10] sm:$0xff] %vm333_vm2, %v618_v24 }
 0x18d   : > { %655 = vst.msk [vmem:[#allocation3 + $0x10] sm:$0xff] %vm333_vm2, %v651_v25  ;;  %v615_v30 = vpop.xlane.xlu0 %614 }
 0x18e   : > { %v680_v31 = vsub.f32 %v672_v29, %v676_v28  ;;  %v619_v32 = vadd.f32 %v615_v30, %v603_v27 }
 0x18f   : > { %v661_v33 = vld [vmem:[#allocation2 + $0x8] sm:$0xff] }
 0x190   : > { %v669_v34 = vld [vmem:[#allocation3 + $0x8] sm:$0xff]  ;;  %v684_v36 = vadd.f32 1e-05, %v680_v31  ;;  %v665_v37 = vmul.f32 0.00390625, %v661_v33  ;;  %624 = vst.msk [vmem:[#allocation2 + $0x18] sm:$0xff] %vm333_vm2, %v619_v32 }
 0x191   : > { %v648_v38 = vpop.xlane.xlu0 %647  ;;  %v673_v40 = vmul.f32 0.00390625, %v669_v34 }
 0x192   : > { %889 = vrsqrt.f32 %v684_v36  ;;  %v677_v39 = vmul.f32 %v665_v37, %v665_v37  ;;  %693 = vst.msk [vmem:[%s1047_s15 + $0x8] sm:$0xff] %vm333_vm2, %v665_v37  ;;  %v652_v41 = vadd.f32 %v648_v38, %v628_v35 }
 0x193   : > { %v662_v42 = vld [vmem:[#allocation2 + $0x10] sm:$0xff] }
 0x194   : > { %v670_v43 = vld [vmem:[#allocation3 + $0x10] sm:$0xff]  ;;  %v681_v44 = vsub.f32 %v673_v40, %v677_v39  ;;  %v666_v45 = vmul.f32 0.00390625, %v662_v42  ;;  %656 = vst.msk [vmem:[#allocation3 + $0x18] sm:$0xff] %vm333_vm2, %v652_v41 }
 0x195   : > { %v674_v46 = vmul.f32 0.00390625, %v670_v43 }
 0x196   : > { %v685_v47 = vadd.f32 1e-05, %v681_v44  ;;  %v678_v48 = vmul.f32 %v666_v45, %v666_v45  ;;  %694 = vst.msk [vmem:[%s1047_s15 + $0x10] sm:$0xff] %vm333_vm2, %v666_v45 }
 0x197   : > { %v663_v49 = vld [vmem:[#allocation2 + $0x18] sm:$0xff] }
 0x198   : > { %891 = vrsqrt.f32 %v685_v47  ;;  %v682_v50 = vsub.f32 %v674_v46, %v678_v48  ;;  %v667_v51 = vmul.f32 0.00390625, %v663_v49 }
 0x19a   : > { %v686_v52 = vadd.f32 1e-05, %v682_v50  ;;  %695 = vst.msk [vmem:[%s1047_s15 + $0x18] sm:$0xff] %vm333_vm2, %v667_v51  ;;  %v679_v55 = vmul.f32 %v667_v51, %v667_v51 }
 0x19b   : > { %v671_v53 = vld [vmem:[#allocation3 + $0x18] sm:$0xff] }
 0x19c   : > { %v890_v54 = vpop.eup %889  ;;  %893 = vrsqrt.f32 %v686_v52  ;;  %v675_v56 = vmul.f32 0.00390625, %v671_v53 }
 0x19d   : > { %696 = vst.msk [vmem:[%s328_s18] sm:$0xff] %vm333_vm2, %v890_v54 }
 0x19e   : > { %v683_v57 = vsub.f32 %v675_v56, %v679_v55 }
 0x1a0   : > { %v687_v58 = vadd.f32 1e-05, %v683_v57 }
 0x1a2   : > { %v892_v59 = vpop.eup %891  ;;  %895 = vrsqrt.f32 %v687_v58 }
 0x1a3   : > { %697 = vst.msk [vmem:[%s328_s18 + $0x8] sm:$0xff] %vm333_vm2, %v892_v59 }
 0x1a6   : > { %v894_v60 = vpop.eup %893 }
 0x1a7   : > { %698 = vst.msk [vmem:[%s328_s18 + $0x10] sm:$0xff] %vm333_vm2, %v894_v60 }
 0x1ac   : > { %v896_v61 = vpop.eup %895 }
 0x1ad   : > { %699 = vst.msk [vmem:[%s328_s18 + $0x18] sm:$0xff] %vm333_vm2, %v896_v61 }
 0x1ae PF: > { %s17_s23 = sadd.s32 1, %s919_s23   ;;  %s1086_s21 = smov %s915_s22 }
 0x1af   : > { %p14_p5 = scmp.ge.s32.totalorder %s17_s23, 4   ;;  %s1087_s22 = smov %s1089_s24 }
 0x1b1   :  { %16 = sbr.rel (!%p14_p5) target bundleno = 2 (0x2), region = 93 }

</bundles_post_ra>
